<compile_context>
chip_gen: v6e
topology: v6e:2x2x1
jax: 0.10.0
libtpu: 0.0.40
codegen_flags: <defaults>
</compile_context>

<pallas_src>
from functools import partial

import jax
import jax.numpy as jnp
import numpy as np
from jax.experimental import pallas as pl
from jax.experimental.pallas import tpu as pltpu


def _conv_sigmoid_kernel(x_ref, w_ref, o_ref):
    """One batch element: one MXU matmul + fused (bias already folded) sigmoid.

    x_ref: (Kp, Mp)   bf16 im2col tile; row K holds ones (carries the bias),
                      rows K+1..Kp-1 and lanes M..Mp-1 are zero padding.
    w_ref: (Cout, Kp) bf16 weight matrix; column K holds the bias.
    o_ref: (Cout, Mp) f32 output (lane-dense, junk lanes discarded by wrapper).
    """
    acc = jnp.dot(w_ref[...], x_ref[...], preferred_element_type=jnp.float32)
    # sigmoid: exp lowers to the EUP slot; exact reciprocal keeps 1e-5 accuracy.
    o_ref[...] = (1.0 / (1.0 + jnp.exp(-acc))).astype(o_ref.dtype)


@partial(jax.jit, static_argnames=("dilation", "padding"))
def dilated_conv2d_sigmoid(x_nchw, w_oihw, bias,
                           dilation=(2, 3), padding=(0, 1)):
    """sigmoid(conv2d(x) + bias), stride 1, given dilation/padding. NCHW."""
    N, Cin, H, W = x_nchw.shape
    Cout, Cin_w, KH, KW = w_oihw.shape
    assert Cin_w == Cin
    dh, dw = dilation
    ph, pw = padding

    Hp, Wp = H + 2 * ph, W + 2 * pw
    OH = Hp - (KH - 1) * dh
    OW = Wp - (KW - 1) * dw
    assert OH > 0 and OW > 0, "conv output size must be positive"

    M = OH * Wp                          # flattened-HW output width (has junk cols)
    Mp = ((M + 127) // 128) * 128        # lane-dense padded width
    K = KH * KW * Cin                    # contraction length (taps x channels)
    Kp = -(-(K + 1) // 8) * 8            # +1 ones-row for bias, round to sublane

    # ---- im2col in the jitted wrapper (XLA fuses the shifted flat slices) ----
    xp = jnp.pad(x_nchw.astype(jnp.float32),
                 ((0, 0), (0, 0), (ph, ph), (pw, pw)))
    xflat = xp.reshape(N, Cin, Hp * Wp)
    max_off = (KH - 1) * dh * Wp + (KW - 1) * dw
    extra = max(0, max_off + M - Hp * Wp)          # tail zeros so last tap is in-bounds
    if extra:
        xflat = jnp.pad(xflat, ((0, 0), (0, 0), (0, extra)))

    taps = jnp.stack(
        [xflat[:, :, kh * dh * Wp + kw * dw: kh * dh * Wp + kw * dw + M]
         for kh in range(KH) for kw in range(KW)],
        axis=1)                                    # (N, KH*KW, Cin, M) tap-major
    im2col = taps.reshape(N, K, M)
    ones_row = jnp.ones((N, 1, M), jnp.float32)    # carries the bias through the matmul
    im2col = jnp.concatenate([im2col, ones_row], axis=1)          # (N, K+1, M)
    im2col = jnp.pad(im2col, ((0, 0), (0, Kp - (K + 1)), (0, Mp - M)))
    im2col = im2col.astype(jnp.bfloat16)           # native MXU dtype, f32 accumulate

    # ---- weights: (Cout, Cin, KH, KW) -> (Cout, K) + bias column, pad to Kp ----
    wmat = (w_oihw.astype(jnp.float32)
            .transpose(0, 2, 3, 1)                 # (Cout, KH, KW, Cin): cin minor
            .reshape(Cout, K))
    wmat = jnp.concatenate(
        [wmat, bias.astype(jnp.float32).reshape(Cout, 1)], axis=1)  # (Cout, K+1)
    wmat = jnp.pad(wmat, ((0, 0), (0, Kp - (K + 1)))).astype(jnp.bfloat16)

    out_flat = pl.pallas_call(
        _conv_sigmoid_kernel,
        out_shape=jax.ShapeDtypeStruct((N, Cout, Mp), jnp.float32),
        grid=(N,),
        in_specs=[
            pl.BlockSpec((None, Kp, Mp), lambda n: (n, 0, 0)),   # per-batch im2col
            pl.BlockSpec((Cout, Kp), lambda n: (0, 0)),          # shared weights
        ],
        out_specs=pl.BlockSpec((None, Cout, Mp), lambda n: (n, 0, 0)),
        compiler_params=pltpu.CompilerParams(
            dimension_semantics=("parallel",)),
    )(im2col, wmat)

    # Drop lane padding and the flatten-HW junk columns.
    out = out_flat[:, :, :M].reshape(N, Cout, OH, Wp)[:, :, :, :OW]
    return out


def _reference(x_nchw, w_oihw, bias, dilation=(2, 3), padding=(0, 1),
               *, match_bf16=False):
    """XLA reference conv+sigmoid. match_bf16 rounds inputs like the kernel does."""
    x, w, b = (x_nchw.astype(jnp.float32), w_oihw.astype(jnp.float32),
               bias.astype(jnp.float32))
    if match_bf16:
        x = x.astype(jnp.bfloat16).astype(jnp.float32)
        w = w.astype(jnp.bfloat16).astype(jnp.float32)
        b = b.astype(jnp.bfloat16).astype(jnp.float32)
    y = jax.lax.conv_general_dilated(
        x, w, window_strides=(1, 1),
        padding=((padding[0], padding[0]), (padding[1], padding[1])),
        rhs_dilation=dilation,
        dimension_numbers=("NCHW", "OIHW", "NCHW"))
    return jax.nn.sigmoid(y + b.reshape(1, -1, 1, 1))


if __name__ == "__main__":
    key = jax.random.PRNGKey(0)
    k_x, k_w, k_b = jax.random.split(key, 3)

    # Small shapes consistent with the module: Conv2d(3 -> 16, k=3), N=1.
    N, Cin, H, W = 1, 3, 16, 16
    Cout, KH, KW = 16, 3, 3

    x1 = jax.random.normal(k_x, (N, Cin, H, W), dtype=jnp.float32)
    weight = jax.random.normal(k_w, (Cout, Cin, KH, KW), dtype=jnp.float32) * 0.1
    bias = jax.random.normal(k_b, (Cout,), dtype=jnp.float32) * 0.1

    out = jax.block_until_ready(dilated_conv2d_sigmoid(x1, weight, bias))
    ref_match = jax.block_until_ready(
        _reference(x1, weight, bias, match_bf16=True))
    ref_f32 = jax.block_until_ready(_reference(x1, weight, bias))

    assert out.shape == ref_f32.shape, (out.shape, ref_f32.shape)
    # Strict check against a reference with matching (bf16-input, f32-accum) numerics.
    np.testing.assert_allclose(np.asarray(out), np.asarray(ref_match),
                               rtol=1e-5, atol=1e-5)
    # Semantic sanity check against the pure-f32 reference (bf16 input rounding).
    np.testing.assert_allclose(np.asarray(out), np.asarray(ref_f32),
                               rtol=0.0, atol=5e-2)
    print("KERNEL_OK")
</pallas_src>

<mosaic_0001>
module attributes {stable_mosaic.version = 11 : i64} {
  func.func @_conv_sigmoid_kernel(%arg0: i32, %arg1: memref<1x32x256xbf16, #tpu.memory_space<vmem>>, %arg2: memref<16x32xbf16, #tpu.memory_space<vmem>>, %arg3: memref<1x16x256xf32, #tpu.memory_space<vmem>>) attributes {dimension_semantics = [#tpu.dimension_semantics<parallel>], iteration_bounds = array<i64: 1>, scalar_prefetch = 0 : i64, scratch_operands = 0 : i64, tpu.core_type = #tpu.core_type<tc>, window_params = [{transform_indices = @transform_0, window_bounds = array<i64: 1, 32, 256>}, {pipeline_mode = #tpu.pipeline_mode<synchronous>, transform_indices = @transform_1, window_bounds = array<i64: 16, 32>}, {transform_indices = @transform_2, window_bounds = array<i64: 1, 16, 256>}]} {
    %c0 = arith.constant 0 : index
    %c0_0 = arith.constant 0 : index
    %0 = vector.load %arg2[%c0, %c0_0] : memref<16x32xbf16, #tpu.memory_space<vmem>>, vector<16x32xbf16>
    %c0_1 = arith.constant 0 : index
    %c0_2 = arith.constant 0 : index
    %c0_3 = arith.constant 0 : index
    %1 = vector.load %arg1[%c0_1, %c0_2, %c0_3] : memref<1x32x256xbf16, #tpu.memory_space<vmem>>, vector<1x32x256xbf16>
    %2 = vector.shape_cast %1 : vector<1x32x256xbf16> to vector<32x256xbf16>
    %cst = arith.constant dense<0.000000e+00> : vector<16x256xf32>
    %3 = tpu.matmul %0, %2, %cst {dimension_numbers = #tpu.dot_dimension_numbers<[1], [0], [0], [1], [0, 0, 1, 1], [], []>} : vector<16x32xbf16>, vector<32x256xbf16>, vector<16x256xf32> -> vector<16x256xf32>
    %cst_4 = arith.constant 0.000000e+00 : f32
    %4 = vector.broadcast %cst_4 : f32 to vector<16x256xf32>
    %5 = arith.subf %4, %3 : vector<16x256xf32>
    %6 = math.exp %5 : vector<16x256xf32>
    %cst_5 = arith.constant 1.000000e+00 : f32
    %7 = vector.broadcast %cst_5 : f32 to vector<16x256xf32>
    %8 = arith.addf %7, %6 : vector<16x256xf32>
    %cst_6 = arith.constant 1.000000e+00 : f32
    %9 = vector.broadcast %cst_6 : f32 to vector<16x256xf32>
    %10 = arith.divf %9, %8 : vector<16x256xf32>
    %c0_7 = arith.constant 0 : index
    %c0_8 = arith.constant 0 : index
    %c0_9 = arith.constant 0 : index
    %11 = vector.load %arg3[%c0_7, %c0_8, %c0_9] : memref<1x16x256xf32, #tpu.memory_space<vmem>>, vector<1x16x256xf32>
    %12 = vector.shape_cast %11 : vector<1x16x256xf32> to vector<16x256xf32>
    %13 = vector.shape_cast %10 : vector<16x256xf32> to vector<1x16x256xf32>
    tpu.vector_store %arg3[%c0_7, %c0_8, %c0_9], %13 {strides = array<i32>} : memref<1x16x256xf32, #tpu.memory_space<vmem>>, vector<1x16x256xf32>,
    return
  }
  func.func @transform_0(%arg0: i32) -> (i32, i32, i32) {
    %c0_i32 = arith.constant 0 : i32
    %c0_i32_0 = arith.constant 0 : i32
    %c0_i32_1 = arith.constant 0 : i32
    return %arg0, %c0_i32, %c0_i32_0 : i32, i32, i32
  }
  func.func @transform_1(%arg0: i32) -> (i32, i32) {
    %c0_i32 = arith.constant 0 : i32
    %c0_i32_0 = arith.constant 0 : i32
    %c0_i32_1 = arith.constant 0 : i32
    return %c0_i32, %c0_i32_0 : i32, i32
  }
  func.func @transform_2(%arg0: i32) -> (i32, i32, i32) {
    %c0_i32 = arith.constant 0 : i32
    %c0_i32_0 = arith.constant 0 : i32
    %c0_i32_1 = arith.constant 0 : i32
    return %arg0, %c0_i32, %c0_i32_0 : i32, i32, i32
  }
}

</mosaic_0001>

<bundles_post_ra>
// kernel: dilated_conv2d_sigmoid.1
= control target key start
LH: loop header
LB: loop body
LE: loop exit
PB: predicated region body
PF: predicated region fallthrough
CT: control target
= control target key end

     0   :  { %v152_v1 = vmov 0   ;;  %vm43_vm0 = vcmask 261120   ;;  %s195_s0 = inlined_call_operand.vmem [shape: bf16[1,32,256], index: 0, kind: input, shape index: {}]   ;;  %s196_s1 = inlined_call_operand.vmem [shape: bf16[16,32], index: 1, kind: input, shape index: {}]   ;;  %s197_s2 = inlined_call_operand.vmem [shape: f32[1,16,256], index: 2, kind: output, shape index: {}]  }
   0x1   :  { %v129_v0 = vld [vmem:[%s195_s0 + $0x14] ss:$8 sps:$4 sm:$0xff]   ;;  %79 = vmatprep.mubr.bf16.mxu0 %v152_v1  ;;  %v131_v2 = vld [vmem:[%s195_s0 + $0x10] ss:$8 sps:$4 sm:$0xff]   ;;  %v132_v3 = vld [vmem:[%s195_s0 + $0x4] ss:$8 sps:$4 sm:$0xff]  }
   0x2   :  { %59 = vmatprep.subr.bf16.mxu0 %v129_v0  ;;  %v134_v4 = vld [vmem:[%s195_s0] ss:$8 sps:$4 sm:$0xff]  }
   0x3   :  { %60 = vmatpush1.bf16.msra.mxu0 %v131_v2  ;;  %v135_v5 = vld [vmem:[%s196_s1] sm:$0xff]  }
   0x4   :  { %61 = vmatprep.subr.bf16.mxu0 %v132_v3 }
   0x7   :  { %62 = vmatpush1.bf16.msra.mxu0 %v134_v4 }
   0xa   :  { %127 = vmatmul.mubr.msk.bf16.vlgmr.msra.gmra.mxu0 %vm43_vm0, %v135_v5 }
  0xca   :  { %v81_v6 = vpop.f32.mrf.mxu0 }
  0xcb   :  { %v90_v7 = vsub.f32 0.0, %v81_v6 }
  0xcc   :  { %v83_v8 = vpop.f32.mrf.mxu0 }
  0xcd   :  { %v94_v9 = vmul.f32 1.442695, %v90_v7  ;;  %v91_v10 = vsub.f32 0.0, %v83_v8 }
  0xce   :  { %v85_v11 = vpop.f32.mrf.mxu0 }
  0xcf   :  { %136 = vpow2.f32 %v94_v9  ;;  %v96_v12 = vmul.f32 1.442695, %v91_v10  ;;  %v92_v13 = vsub.f32 0.0, %v85_v11 }
  0xd0   :  { %v87_v14 = vpop.f32.mrf.mxu0 }
  0xd1   :  { %138 = vpow2.f32 %v96_v12  ;;  %v98_v15 = vmul.f32 1.442695, %v92_v13  ;;  %v93_v16 = vsub.f32 0.0, %v87_v14 }
  0xd3   :  { %140 = vpow2.f32 %v98_v15  ;;  %v100_v17 = vmul.f32 1.442695, %v93_v16 }
  0xd5   :  { %142 = vpow2.f32 %v100_v17 }
  0xdc   :  { %v137_v18 = vpop.eup %136 }
  0xdd   :  { %v102_v19 = vadd.f32 1.0, %v137_v18 }
  0xde   :  { %v139_v20 = vpop.eup %138 }
  0xdf   :  { %144 = vrcp.f32 %v102_v19  ;;  %v103_v21 = vadd.f32 1.0, %v139_v20 }
  0xe0   :  { %v141_v22 = vpop.eup %140 }
  0xe1   :  { %146 = vrcp.f32 %v103_v21  ;;  %v104_v23 = vadd.f32 1.0, %v141_v22 }
  0xe2   :  { %v143_v24 = vpop.eup %142 }
  0xe3   :  { %148 = vrcp.f32 %v104_v23  ;;  %v105_v25 = vadd.f32 1.0, %v143_v24 }
  0xe5   :  { %150 = vrcp.f32 %v105_v25 }
  0xec   :  { %v145_v26 = vpop.eup %144 }
  0xed   :  { %114 = vst [vmem:[%s197_s2] sm:$0xff] %v145_v26 }
  0xee   :  { %v147_v27 = vpop.eup %146 }
  0xef   :  { %115 = vst [vmem:[%s197_s2 + $0x8] sm:$0xff] %v147_v27 }
  0xf0   :  { %v149_v28 = vpop.eup %148 }
  0xf1   :  { %116 = vst [vmem:[%s197_s2 + $0x10] sm:$0xff] %v149_v28 }
  0xf2   :  { %v151_v29 = vpop.eup %150 }
  0xf3   :  { %117 = vst [vmem:[%s197_s2 + $0x18] sm:$0xff] %v151_v29 }

</bundles_post_ra>
